<compile_context>
chip_gen: v5e
topology: v5e:2x2
jax: 0.10.0
libtpu: 0.0.40
codegen_flags: <defaults>
</compile_context>

<pallas_src>
import jax
import jax.numpy as jnp
from jax import lax
from jax.experimental import pallas as pl
from jax.experimental.pallas import tpu as pltpu

EPS = 1e-5  # nn.LayerNorm default


def _round_up(v: int, m: int) -> int:
    return ((v + m - 1) // m) * m


def _vmem_budget_bytes() -> int:
    """Per-generation VMEM budget (leave ~1/8 headroom for compiler scratch)."""
    try:
        cap = int(pltpu.get_tpu_info().vmem_capacity_bytes)
    except Exception:
        cap = 64 << 20  # conservative (v7x per-TC) fallback
    return max(48 << 20, (cap * 7) // 8)


def _plan_tiles(M: int, D: int, itemsize: int, budget: int):
    """Pick (tm, tn, nj, vmem_limit) from a VMEM byte budget."""
    # --- weight layout: resident (single-buffered) vs streamed column panels ---
    resident_w = D * D * 2  # bf16
    if D % 128 != 0 or resident_w <= budget // 3:
        tn = D
        w_bytes = resident_w  # single-buffered resident weight
    else:
        # Stream (D, tn) panels, double-buffered; target <= ~1/3 of the budget.
        q = D // 128
        target = max(1, (budget // 3) // (2 * D * 2 * 128))
        t = min(q, target)
        while q % t != 0:  # tn must divide D so no partial weight panels
            t -= 1
        tn = 128 * t
        w_bytes = 2 * D * tn * 2
    nj = D // tn

    # --- row tile sized from remaining budget ---
    bytes_per_row = (2 * D * itemsize      # double-buffered x tile
                     + 2 * tn * itemsize   # double-buffered output tile
                     + 2 * D               # bf16 LayerNorm scratch
                     + 3 * D * 4)          # f32 temporaries headroom
    tm = max(8, (budget - w_bytes - (4 << 20)) // bytes_per_row)
    if tm >= 256:
        tm = (tm // 256) * 256             # MXU-friendly row multiple
    else:
        tm = max(8, (tm // 8) * 8)
    tm = min(tm, _round_up(M, 8))
    if M > 8:
        # keep >= 2 row blocks so the "parallel" axis can shard across v7x's 2 TensorCores
        tm = min(tm, max(8, _round_up(-(-M // 2), 8)))
    tm = max(8, tm)

    vmem_limit = int(w_bytes + tm * bytes_per_row + (6 << 20))
    vmem_limit = min(max(vmem_limit, 32 << 20), budget)
    return tm, tn, nj, vmem_limit


def _make_kernel(d: int, tn: int, nj: int):
    inv_d = 1.0 / d

    def kernel(x_ref, gamma_ref, beta_ref, w_ref, b_ref, out_ref, y_ref):
        # x_ref: (tm, D)  gamma/beta: (1, D)  w_ref: (D, tn) bf16  b_ref: (1, tn)
        # out_ref: (tm, tn)  y_ref: (tm, D) bf16 scratch (normalized activations)

        def layer_norm():
            x = x_ref[...].astype(jnp.float32)
            mean = jnp.sum(x, axis=-1, keepdims=True) * inv_d
            centered = x - mean
            var = jnp.sum(centered * centered, axis=-1, keepdims=True) * inv_d
            inv_std = lax.rsqrt(var + EPS)
            # Fold gamma * inv_std into one per-row scale; store bf16 for the MXU.
            y_ref[...] = (centered * (inv_std * gamma_ref[...])
                          + beta_ref[...]).astype(y_ref.dtype)

        if nj == 1:
            layer_norm()
        else:
            pl.when(pl.program_id(1) == 0)(layer_norm)  # compute LN once per row tile

        # --- sublayer: Linear(D, D) column panel on the MXU (bf16 x bf16 -> f32 acc) ---
        s = jnp.dot(y_ref[...], w_ref[...],
                    preferred_element_type=jnp.float32) + b_ref[...]

        # --- dropout (eval mode => identity) + residual (re-read x slice; short live range) ---
        if nj == 1:
            x_res = x_ref[...]
        else:
            col = pl.multiple_of(pl.program_id(1) * tn, 128)
            x_res = x_ref[:, pl.ds(col, tn)]
        out_ref[...] = (x_res.astype(jnp.float32) + s).astype(out_ref.dtype)

    return kernel


def prepare_params(gamma, beta, w, b):
    """One-time parameter prep (hoisted out of the per-call hot path)."""
    D = w.shape[0]
    return {
        "gamma": gamma.reshape(1, D).astype(jnp.float32),
        "beta": beta.reshape(1, D).astype(jnp.float32),
        "w": w.astype(jnp.bfloat16),   # MXU-native resident weight, cast once
        "b": b.reshape(1, D).astype(jnp.float32),
    }


def sublayer_connection(x, params):
    """x: (B, S, D); params from prepare_params. Returns (B, S, D)."""
    B, S, D = x.shape
    M = B * S
    itemsize = jnp.dtype(x.dtype).itemsize

    budget = _vmem_budget_bytes()
    tm, tn, nj, vmem_limit = _plan_tiles(M, D, itemsize, budget)

    x2 = x.reshape(M, D)  # pure reshape: no pad, no extra HBM pass

    if nj == 1:
        # Constant index_map -> fetched once; single-buffer to halve its VMEM footprint.
        w_spec = pl.BlockSpec((D, tn), lambda i, j: (0, j),
                              pipeline_mode=pl.Buffered(1))
    else:
        # Streaming column panels: keep default double-buffering to overlap weight DMA.
        w_spec = pl.BlockSpec((D, tn), lambda i, j: (0, j))

    kernel = _make_kernel(D, tn, nj)

    out = pl.pallas_call(
        kernel,
        out_shape=jax.ShapeDtypeStruct((M, D), x.dtype),
        grid=(pl.cdiv(M, tm), nj),
        in_specs=[
            pl.BlockSpec((tm, D), lambda i, j: (i, 0)),   # x rows (reused across j)
            pl.BlockSpec((1, D), lambda i, j: (0, 0)),    # gamma
            pl.BlockSpec((1, D), lambda i, j: (0, 0)),    # beta
            w_spec,                                        # weight (resident or panel)
            pl.BlockSpec((1, tn), lambda i, j: (0, j)),   # linear bias panel
        ],
        out_specs=pl.BlockSpec((tm, tn), lambda i, j: (i, j)),
        scratch_shapes=[pltpu.VMEM((tm, D), jnp.bfloat16)],  # normalized activations
        compiler_params=pltpu.CompilerParams(
            dimension_semantics=("parallel", "arbitrary"),
            vmem_limit_bytes=int(vmem_limit),
        ),
    )(x2, params["gamma"], params["beta"], params["w"], params["b"])

    return out.reshape(B, S, D)


def _reference(x, gamma, beta, w, b):
    mean = jnp.mean(x, axis=-1, keepdims=True)
    var = jnp.mean((x - mean) ** 2, axis=-1, keepdims=True)
    xn = (x - mean) / jnp.sqrt(var + EPS)
    y = xn * gamma + beta
    # Match the kernel's bf16 MXU operands (f32 accumulation).
    y16 = y.astype(jnp.bfloat16).astype(jnp.float32)
    w16 = w.astype(jnp.bfloat16).astype(jnp.float32)
    s = jnp.einsum("bsd,de->bse", y16, w16, precision=lax.Precision.HIGHEST) + b
    return x + s


if __name__ == "__main__":
    B, S, D = 2, 8, 32  # (batch_size, seq_len, d_model)

    key = jax.random.PRNGKey(0)
    kx, kw, kb = jax.random.split(key, 3)

    x = jax.random.normal(kx, (B, S, D), dtype=jnp.float32)

    # LayerNorm params (PyTorch init: weight=1, bias=0)
    gamma = jnp.ones((D,), dtype=jnp.float32)
    beta = jnp.zeros((D,), dtype=jnp.float32)

    # Deterministic sublayer (Linear D->D) params
    w = jax.random.normal(kw, (D, D), dtype=jnp.float32) * 0.05
    b = jax.random.normal(kb, (D,), dtype=jnp.float32) * 0.01

    params = prepare_params(gamma, beta, w, b)  # one-time bf16 cast / reshape
    out = sublayer_connection(x, params)
    jax.block_until_ready(out)

    ref = _reference(x, gamma, beta, w, b)
    assert out.shape == (B, S, D)
    err = float(jnp.max(jnp.abs(out - ref)))
    assert jnp.allclose(out, ref, atol=1e-2, rtol=1e-2), err

    print("KERNEL_OK")
</pallas_src>

<mosaic_0001>
module attributes {stable_mosaic.version = 11 : i64} {
  func.func @kernel(%arg0: i32, %arg1: i32, %arg2: memref<8x32xf32, #tpu.memory_space<vmem>>, %arg3: memref<1x32xf32, #tpu.memory_space<vmem>>, %arg4: memref<1x32xf32, #tpu.memory_space<vmem>>, %arg5: memref<32x32xbf16, #tpu.memory_space<vmem>>, %arg6: memref<1x32xf32, #tpu.memory_space<vmem>>, %arg7: memref<8x32xf32, #tpu.memory_space<vmem>>, %arg8: memref<8x32xbf16, #tpu.memory_space<vmem>>) attributes {dimension_semantics = [#tpu.dimension_semantics<parallel>, #tpu.dimension_semantics<arbitrary>], iteration_bounds = array<i64: 2, 1>, scalar_prefetch = 0 : i64, scratch_operands = 1 : i64, tpu.core_type = #tpu.core_type<tc>, window_params = [{transform_indices = @transform_0, window_bounds = array<i64: 8, 32>}, {pipeline_mode = #tpu.pipeline_mode<synchronous>, transform_indices = @transform_1, window_bounds = array<i64: 1, 32>}, {pipeline_mode = #tpu.pipeline_mode<synchronous>, transform_indices = @transform_2, window_bounds = array<i64: 1, 32>}, {pipeline_mode = #tpu.pipeline_mode<synchronous>, transform_indices = @transform_3, window_bounds = array<i64: 32, 32>}, {transform_indices = @transform_4, window_bounds = array<i64: 1, 32>}, {transform_indices = @transform_5, window_bounds = array<i64: 8, 32>}]} {
    %c0 = arith.constant 0 : index
    %c0_0 = arith.constant 0 : index
    %0 = vector.load %arg2[%c0, %c0_0] : memref<8x32xf32, #tpu.memory_space<vmem>>, vector<8x32xf32>
    %cst = arith.constant dense<0.000000e+00> : vector<8xf32>
    %1 = vector.multi_reduction <add>, %0, %cst [1] : vector<8x32xf32> to vector<8xf32>
    %2 = vector.shape_cast %1 : vector<8xf32> to vector<8x1xf32>
    %cst_1 = arith.constant 3.125000e-02 : f32
    %3 = vector.broadcast %cst_1 : f32 to vector<8x1xf32>
    %4 = arith.mulf %2, %3 : vector<8x1xf32>
    %5 = vector.broadcast %4 : vector<8x1xf32> to vector<8x32xf32>
    %6 = arith.subf %0, %5 : vector<8x32xf32>
    %7 = arith.mulf %6, %6 : vector<8x32xf32>
    %cst_2 = arith.constant dense<0.000000e+00> : vector<8xf32>
    %8 = vector.multi_reduction <add>, %7, %cst_2 [1] : vector<8x32xf32> to vector<8xf32>
    %9 = vector.shape_cast %8 : vector<8xf32> to vector<8x1xf32>
    %cst_3 = arith.constant 3.125000e-02 : f32
    %10 = vector.broadcast %cst_3 : f32 to vector<8x1xf32>
    %11 = arith.mulf %9, %10 : vector<8x1xf32>
    %cst_4 = arith.constant 9.99999974E-6 : f32
    %12 = vector.broadcast %cst_4 : f32 to vector<8x1xf32>
    %13 = arith.addf %11, %12 : vector<8x1xf32>
    %14 = math.rsqrt %13 : vector<8x1xf32>
    %c0_5 = arith.constant 0 : index
    %c0_6 = arith.constant 0 : index
    %15 = vector.load %arg3[%c0_5, %c0_6] : memref<1x32xf32, #tpu.memory_space<vmem>>, vector<1x32xf32>
    %16 = vector.broadcast %14 : vector<8x1xf32> to vector<8x32xf32>
    %17 = vector.broadcast %15 : vector<1x32xf32> to vector<8x32xf32>
    %18 = arith.mulf %16, %17 : vector<8x32xf32>
    %19 = arith.mulf %6, %18 : vector<8x32xf32>
    %c0_7 = arith.constant 0 : index
    %c0_8 = arith.constant 0 : index
    %20 = vector.load %arg4[%c0_7, %c0_8] : memref<1x32xf32, #tpu.memory_space<vmem>>, vector<1x32xf32>
    %21 = vector.broadcast %20 : vector<1x32xf32> to vector<8x32xf32>
    %22 = arith.addf %19, %21 : vector<8x32xf32>
    %23 = arith.truncf %22 : vector<8x32xf32> to vector<8x32xbf16>
    %c0_9 = arith.constant 0 : index
    %c0_10 = arith.constant 0 : index
    %24 = vector.load %arg8[%c0_9, %c0_10] : memref<8x32xbf16, #tpu.memory_space<vmem>>, vector<8x32xbf16>
    tpu.vector_store %arg8[%c0_9, %c0_10], %23 {strides = array<i32>} : memref<8x32xbf16, #tpu.memory_space<vmem>>, vector<8x32xbf16>,
    %c0_11 = arith.constant 0 : index
    %c0_12 = arith.constant 0 : index
    %25 = vector.load %arg8[%c0_11, %c0_12] : memref<8x32xbf16, #tpu.memory_space<vmem>>, vector<8x32xbf16>
    %c0_13 = arith.constant 0 : index
    %c0_14 = arith.constant 0 : index
    %26 = vector.load %arg5[%c0_13, %c0_14] : memref<32x32xbf16, #tpu.memory_space<vmem>>, vector<32x32xbf16>
    %cst_15 = arith.constant dense<0.000000e+00> : vector<8x32xf32>
    %27 = tpu.matmul %25, %26, %cst_15 {dimension_numbers = #tpu.dot_dimension_numbers<[1], [0], [0], [1], [0, 0, 1, 1], [], []>} : vector<8x32xbf16>, vector<32x32xbf16>, vector<8x32xf32> -> vector<8x32xf32>
    %c0_16 = arith.constant 0 : index
    %c0_17 = arith.constant 0 : index
    %28 = vector.load %arg6[%c0_16, %c0_17] : memref<1x32xf32, #tpu.memory_space<vmem>>, vector<1x32xf32>
    %29 = vector.broadcast %28 : vector<1x32xf32> to vector<8x32xf32>
    %30 = arith.addf %27, %29 : vector<8x32xf32>
    %c0_18 = arith.constant 0 : index
    %c0_19 = arith.constant 0 : index
    %31 = vector.load %arg2[%c0_18, %c0_19] : memref<8x32xf32, #tpu.memory_space<vmem>>, vector<8x32xf32>
    %32 = arith.addf %31, %30 : vector<8x32xf32>
    %c0_20 = arith.constant 0 : index
    %c0_21 = arith.constant 0 : index
    %33 = vector.load %arg7[%c0_20, %c0_21] : memref<8x32xf32, #tpu.memory_space<vmem>>, vector<8x32xf32>
    tpu.vector_store %arg7[%c0_20, %c0_21], %32 {strides = array<i32>} : memref<8x32xf32, #tpu.memory_space<vmem>>, vector<8x32xf32>,
    return
  }
  func.func @transform_0(%arg0: i32, %arg1: i32) -> (i32, i32) {
    %c0_i32 = arith.constant 0 : i32
    %c0_i32_0 = arith.constant 0 : i32
    return %arg0, %c0_i32 : i32, i32
  }
  func.func @transform_1(%arg0: i32, %arg1: i32) -> (i32, i32) {
    %c0_i32 = arith.constant 0 : i32
    %c0_i32_0 = arith.constant 0 : i32
    %c0_i32_1 = arith.constant 0 : i32
    return %c0_i32, %c0_i32_0 : i32, i32
  }
  func.func @transform_2(%arg0: i32, %arg1: i32) -> (i32, i32) {
    %c0_i32 = arith.constant 0 : i32
    %c0_i32_0 = arith.constant 0 : i32
    %c0_i32_1 = arith.constant 0 : i32
    return %c0_i32, %c0_i32_0 : i32, i32
  }
  func.func @transform_3(%arg0: i32, %arg1: i32) -> (i32, i32) {
    %c0_i32 = arith.constant 0 : i32
    %c0_i32_0 = arith.constant 0 : i32
    return %c0_i32, %arg1 : i32, i32
  }
  func.func @transform_4(%arg0: i32, %arg1: i32) -> (i32, i32) {
    %c0_i32 = arith.constant 0 : i32
    %c0_i32_0 = arith.constant 0 : i32
    return %c0_i32, %arg1 : i32, i32
  }
  func.func @transform_5(%arg0: i32, %arg1: i32) -> (i32, i32) {
    %c0_i32 = arith.constant 0 : i32
    return %arg0, %arg1 : i32, i32
  }
}

</mosaic_0001>

<bundles_post_ra>
// kernel: tpu_custom_call.1
= control target key start
LH: loop header
LB: loop body
LE: loop exit
PB: predicated region body
PF: predicated region fallthrough
CT: control target
= control target key end

     0   :  { %10 = vsyncpa [#allocation4], 0  ;;  %s1006_s0 = inlined_call_operand.hbm [shape: f32[16,32], index: 0, kind: input, shape index: {}]   ;;  %s1007_s1 = inlined_call_operand.hbm [shape: f32[1,32], index: 1, kind: input, shape index: {}]   ;;  %s1008_s2 = inlined_call_operand.vmem [shape: f32[1,32], index: 2, kind: input, shape index: {}]   ;;  %s1009_s3 = inlined_call_operand.hbm [shape: bf16[32,32], index: 3, kind: input, shape index: {}]   ;;  %s1010_s4 = inlined_call_operand.vmem [shape: f32[1,32], index: 4, kind: input, shape index: {}]   ;;  %s1011_s5 = inlined_call_operand.hbm [shape: f32[16,32], index: 5, kind: output, shape index: {}]  }
   0x1   :  { %12 = vsyncpa [#allocation4 + $0x1], 0 }
   0x2   :  { %13 = vsyncpa [#allocation7], 0 }
   0x3   :  { %14 = vsyncpa [#allocation5], 0 }
   0x4   :  { %16 = vsyncpa [#allocation5 + $0x1], 0  ;;  %s846_s18 = smov 0   ;;  %s848_s19 = smov 0  }
   0x5   :  { %s850_s20 = smov 0   ;;  %s852_s21 = smov 0  }
   0x6   :  { %s854_s22 = smov 0   ;;  %s856_s23 = smov 0  }
   0x7 LB: > { %s515_s24 = sadd.s32 4294967295, %s810_s23   ;;  %s516_s25 = sadd.s32 4294967294, %s810_s23   ;;  %s810_s23 = sphi %s856_s23, %s22_s23   ;;  %s806_s22 = sphi %s854_s22, %s1021_s22   ;;  %s802_s21 = sphi %s852_s21, %s1020_s21   ;;  %s798_s20 = sphi %s850_s20, %s1019_s20   ;;  %s794_s19 = sphi %s848_s19, %s1018_s19   ;;  %s790_s18 = sphi %s846_s18, %s1017_s18  }
   0x8   : > { %p54_p0 = scmp.ne.s32.totalorder %s794_s19, %s790_s18  ;;  %p882_p1 = scmp.eq.s32.totalorder %s515_s24, 0 }
   0x9   : > { %p180_p2 = scmp.eq.s32.totalorder %s516_s25, 1  ;;  %p517_p4 = scmp.ge.s32.totalorder %s810_s23, 1 }
   0xa   : > { %p888_p3 = por %p882_p1, %p54_p0  ;;  %p187_p6 = scmp.lt.s32.totalorder %s810_s23, 3 }
   0xb   : > { %p893_p5 = por %p180_p2, %p54_p0  ;;  %s199_s6 = sshll.u32 %s1007_s1, 4  ;;  %s200_s6 = int_to_ptr.hbm [resolvable:$true] %s199_s6 }
   0xc   : > { %p901_p7 = pnand %p517_p4, %p187_p6  ;;  %p521_p8 = scmp.ge.s32.totalorder %s810_s23, 2 }
   0xd   : > { %s812_s8 = smov [#allocation6]   ;;  %s215_s12 = sshll.u32 %s1009_s3, 4  ;;  %s216_s12 = int_to_ptr.hbm [resolvable:$true] %s215_s12 }
   0xe   : > { %p556_p9 = pneg %p901_p7  ;;  %s201_s9 = sshll.u32 %s812_s8, 4  ;;  %s202_s9 = int_to_ptr.vmem [resolvable:$true] %s201_s9 }
   0xf   : > { %s813_s13 = smov [#allocation8]   ;;  %s814_s15 = smov 64  }
  0x10   : > { %p557_p10 = pnand %p556_p9, %p882_p1  ;;  %s217_s14 = sshll.u32 %s813_s13, 4  ;;  %s218_s14 = int_to_ptr.vmem [resolvable:$true] %s217_s14 }
  0x11   : > { %s815_s16 = smov 4   ;;  %p174_p11 = scmp.eq.s32.totalorder %s515_s24, 1 }
  0x12   : > { %559 = dma.hbm_to_vmem [thread:$0]  (!%p557_p10), %s200_s6, 16, %s202_s9, [#allocation7]  }
  0x13   : > { %562 = dma.hbm_to_vmem [thread:$0]  (!%p557_p10), %s216_s12, 256, %s218_s14, [#allocation7], %s814_s15, %s814_s15, %s815_s16  }
  0x14   : > { %s34_s17 = sadd.s32 1, %s806_s22  ;;  %s41_s25 = sadd.s32 1, %s798_s20 }
  0x15   : > { %p36_p12 = scmp.ge.s32.totalorder %s34_s17, 2  ;;  %p48_p13 = scmp.ne.s32.totalorder %s798_s20, %s794_s19 }
  0x16   : > { %p49_p0 = scmp.eq.s32.totalorder %s810_s23, 0  ;;  %p573_p4 = scmp.lt.s32.totalorder %s810_s23, 2 }
  0x17   : > { %s1023_s17 = smov (%p36_p12, %s34_s17), 0  ;;  %p922_p2 = por %p174_p11, %p48_p13 }
  0x18   : > { %s38_s30 = ssub.s32 %s806_s22, %s1023_s17  ;;  %s237_s6 = sand.u32 1, %s798_s20  }
  0x19   : > { %p39_p6 = scmp.eq.s32.totalorder %s38_s30, 0  ;;  %p50_p9 = por %p49_p0, %p48_p13 }
  0x1a   : > { %s522_s8 = sshll.u32 %s237_s6, 3  ;;  %s523_s24 = sshll.u32 %s806_s22, 3 }
  0x1b   : > { %s932_s9 = scalar_select %p39_p6, %s798_s20, %s41_s25  }
  0x1c   : > { %s245_s12 = scalar_lea.hbm %s1006_s0, %s523_s24  ;;  %s241_s14 = scalar_lea.vmem [#allocation3], %s522_s8 }
  0x1d   : > { %s247_s13 = sshll.u32 %s245_s12, 4  ;;  %s249_s15 = sshll.u32 %s241_s14, 4  ;;  %s248_s13 = int_to_ptr.hbm [resolvable:$true] %s247_s13  ;;  %s250_s15 = int_to_ptr.vmem [resolvable:$true] %s249_s15 }
  0x1e   : > { %p564_p10 = pnand %p573_p4, %p50_p9  ;;  %s238_s16 = scalar_lea.sflag [#allocation4], %s237_s6 }
  0x1f   : > { %258 = sbr.rel (%p901_p7) target bundleno = 452 (0x1c4), region = 40  ;;  %s942_s25 = sand.u32 (!%p901_p7), 1, %s794_s19  }
  0x20   : > { %566 = dma.hbm_to_vmem [thread:$0]  (!%p564_p10), %s248_s13, 128, %s250_s15, %s238_s16  }
  0x21   : > { %s525_s30 = sshll.u32 (!%p901_p7), %s942_s25, 3  ;;  %s261_s24 = scalar_lea.sflag (!%p901_p7), [#allocation4], %s942_s25 }
  0x22   : > { %s264_s8 = scalar_lea.vmem (!%p901_p7), [#allocation3], %s525_s30 }
  0x24   : > { %777 = dma.done.wait (%p888_p3), %s261_s24, 128  }
  0x25   : > { %779 = vsyncadd (%p888_p3), %s261_s24, 4294967168 }
  0x26   : > { %781 = dma.done.wait (%p882_p1), [#allocation7], 272  }
  0x27   : > { %783 = vsyncadd (%p882_p1), [#allocation7], 4294967024  ;;  %vm310_vm0 = vcmask 261120   ;;  %v309_v0 = vld [vmem:[%s264_s8] sm:$0xff]  ;;  %v542_v9 = vld [vmem:[#allocation8] sm:$0xff]  ;;  %vm344_vm4 = vcmask 257024  }
  0x28   : > { %v311_v1 = vsel %vm310_vm0, %v309_v0, 0.0  ;;  %v543_v7 = vld [vmem:[#allocation8 + $0x8] sm:$0xff]  ;;  %v629_v17 = vld [vmem:[#allocation6] ss:$0 sm:$0xff]  ;;  %s539_s7 = sshll.u32 %s802_s21, 3  ;;  %s304_s14 = scalar_lea.vmem [#allocation9], %s525_s30 }
  0x29   : > { %312 = vadd.xlane.f32.xlu0 %v311_v1  ;;  %376 = vmatpush.bf16.msra.mxu0 %v543_v7  ;;  %v630_v20 = vld [vmem:[%s1008_s2] ss:$0 sm:$0xff]  ;;  %s398_s13 = scalar_lea.hbm %s1011_s5, %s539_s7  ;;  %s400_s15 = sshll.u32 %s304_s14, 4  ;;  %s401_s15 = int_to_ptr.vmem [resolvable:$true] %s400_s15 }
  0x2a   : > { %v631_v26 = vld [vmem:[%s1010_s4] ss:$0 sm:$0xff]  ;;  %s402_s16 = sshll.u32 %s398_s13, 4  ;;  %s387_s21 = scalar_lea.sflag [#allocation5], %s942_s25  ;;  %s403_s16 = int_to_ptr.hbm [resolvable:$true] %s402_s16 }
  0x2b   : > { %s738_s24 = sshra.s32 %s403_s16, 4  ;;  %s744_s30 = scalar_lea.hbm %s1011_s5, 16  ;;  %s739_s24 = int_to_ptr.hbm [resolvable:$true] %s738_s24 }
  0x2c   : > { %s740_s8 = scalar_lea.hbm %s739_s24, 8  ;;  %p745_p11 = scmp.lt.s32.totalorder %s739_s24, %s1011_s5 }
  0x2d   : > { %377 = vmatpush.bf16.msra.mxu0 %v542_v9  ;;  %p741_p1 = scmp.ne.s32.totalorder %s739_s24, %s740_s8  ;;  %p746_p12 = scmp.lt.s32.totalorder %s744_s30, %s740_s8 }
  0x2f   : > { %p742_p3 = pnand %p741_p1, %p922_p2  ;;  %p747_p13 = por %p746_p12, %p745_p11 }
  0x31   : > { %p743_p7 = pneg %p742_p3 }
  0x33   : > { %p748_p0 = pnand %p747_p13, %p743_p7 }
  0x9c   : > { %v313_v2 = vpop.xlane.xlu0 %312 }
  0x9d   : > { %v314_v3 = vmul.f32 0.03125, %v313_v2 }
  0x9f   : > { %v315_v4 = vsub.f32 %v309_v0, %v314_v3 }
  0xa1   : > { %v316_v5 = vmul.f32 %v315_v4, %v315_v4 }
  0xa3   : > { %v317_v6 = vsel %vm310_vm0, %v316_v5, 0.0 }
  0xa4   : > { %318 = vadd.xlane.f32.xlu0 %v317_v6 }
 0x117   : > { %v319_v8 = vpop.xlane.xlu0 %318 }
 0x118   : > { %v320_v10 = vmul.f32 0.03125, %v319_v8 }
 0x11a   : > { %v321_v11 = vadd.f32 1e-05, %v320_v10 }
 0x11c   : > { %632 = vrsqrt.f32 %v321_v11  ;;  %vm328_vm2 = vweird.f32 %v321_v11 }
 0x122   : > { %v633_v12 = vpop.eup %632 }
 0x123   : > { %v323_v13 = vmul.f32 %v633_v12, %v321_v11  ;;  %vm329_vm1 = vweird.f32 %v633_v12 }
 0x124   : > { %vm330_vm3 = vmor %vm328_vm2, %vm329_vm1 }
 0x125   : > { %v324_v14 = vmul.f32 %v633_v12, %v323_v13 }
 0x127   : > { %v325_v15 = vmul.f32 0.5, %v324_v14 }
 0x129   : > { %v326_v16 = vsub.f32 1.5, %v325_v15 }
 0x12b   : > { %v327_v18 = vmul.f32 %v633_v12, %v326_v16 }
 0x12d   : > { %v331_v19 = vsel %vm330_vm3, %v633_v12, %v327_v18 }
 0x12e   : > { %v336_v21 = vmul.f32 %v629_v17, %v331_v19 }
 0x130   : > { %v337_v22 = vmul.f32 %v336_v21, %v315_v4 }
 0x132   : > { %v342_v23 = vadd.f32 %v630_v20, %v337_v22 }
 0x134   : > { %v343_v24 = vpack.c.bf16 %v342_v23, %v342_v23 }
 0x136   : > { %345 = vst.msk [vmem:[#allocation2] sm:$0xf] %vm344_vm4, %v343_v24 }
 0x13d   : > { %v346_v25 = vld [vmem:[#allocation2] sm:$0xf] }
 0x13e   : > { %537 = vmatmul.msk.bf16.vlgmr.msra.gmra.mxu0 %vm310_vm0, %v346_v25 }
 0x1bb   : > { %v379_v27 = vpop.f32.mrf.mxu0 }
 0x1bc   : > { %v380_v28 = vadd.f32 %v631_v26, %v379_v27 }
 0x1be   : > { %v384_v29 = vadd.f32 %v380_v28, %v309_v0 }
 0x1c0   : > { %385 = vst.msk [vmem:[%s304_s14] sm:$0xff] %vm310_vm0, %v384_v29 }
 0x1c1   : > { %751 = shalt.err (!%p748_p0)
}
 0x1c2   : > { %554 = dma.vmem_to_hbm [thread:$0]  (%p922_p2), %s401_s15, 128, %s403_s16, %s387_s21  }
 0x1c3   : > { %v381_v30 = vpop.f32.mrf.mxu0 }
 0x1c4 PF: > { %s414_s25 = sand.u32 1, %s790_s18   ;;  %p568_p4 = pnand %p521_p8, %p893_p5 }
 0x1c5   : > { %s415_s10 = scalar_lea.sflag [#allocation5], %s414_s25 }
 0x1c6   : > { %p569_p6 = pneg %p568_p4 }
 0x1c8   : > { %785 = dma.done.wait (%p569_p6), %s415_s10, 128  }
 0x1c9   : > { %787 = vsyncadd (%p569_p6), %s415_s10, 4294967168  ;;  %s22_s23 = sadd.s32 1, %s810_s23   ;;  %s1017_s18 = smov %s794_s19 }
 0x1ca   : > { %p19_p9 = scmp.ge.s32.totalorder %s22_s23, 4   ;;  %s1018_s19 = smov %s798_s20 }
 0x1cb   : > { %s1019_s20 = smov %s932_s9  ;;  %s1020_s21 = smov %s806_s22 }
 0x1cc   : > { %s1021_s22 = smov %s1023_s17  ;;  %21 = sbr.rel (!%p19_p9) target bundleno = 7 (0x7), region = 97 }
 0x1d1   :  { %421 = vsyncpa [#allocation4], 1 }
 0x1d2   :  { %423 = vsyncpa [#allocation4 + $0x1], 1 }
 0x1d3   :  { %424 = vsyncpa [#allocation7], 1 }
 0x1d4   :  { %425 = vsyncpa [#allocation5], 1 }
 0x1d5   :  { %427 = vsyncpa [#allocation5 + $0x1], 1 }

</bundles_post_ra>
